<compile_context>
chip_gen: v7x
topology: tpu7x:2x2x1
jax: 0.10.0
libtpu: 0.0.40
codegen_flags: <defaults>
</compile_context>

<pallas_src>
import functools

import jax
import jax.numpy as jnp
import numpy as np
from jax import lax
from jax.experimental import pallas as pl
from jax.experimental.pallas import tpu as pltpu

_PAD_LOGIT = -1e4                      # exp(-1e4) == 0 in f32 -> padded cells add exactly 0
_VMEM_BLOCK_BUDGET = 16 * 1024 * 1024  # target bytes for (double-buffered inputs + acc)
_VMEM_LIMIT_BYTES = 32 * 1024 * 1024   # raises v5e's 16 MiB default, matches v6e/v7x default


def _make_kernel(c, lanes, tile_rows, steps, num_shards, last_rows):
    """Builds the kernel body. All arguments are Python ints (static)."""
    needs_mask = (last_rows != tile_rows)

    def kernel(pred_ref, tgt_ref, out_ref, acc_ref, objbce_row_ref):
        s = pl.program_id(0)
        j = pl.program_id(1)

        @pl.when(j == 0)
        def _init():
            acc_ref[...] = jnp.zeros_like(acc_ref)
            objbce_row_ref[...] = jnp.zeros_like(objbce_row_ref)

        p = pred_ref[...].astype(jnp.float32)
        t = tgt_ref[...].astype(jnp.float32)

        # (1, lanes) per-channel selector rows; applied via implicit broadcasting.
        ch = lax.broadcasted_iota(jnp.int32, (1, lanes), 1) % c
        w_obj = (ch == 0).astype(jnp.float32)                 # objectness lanes
        w_coord = ((ch == 1) | (ch == 2)).astype(jnp.float32)  # x / y lanes
        w_cnt = (ch == c - 1).astype(jnp.float32)              # "count" parking lanes

        # Numerically stable BCE-with-logits: max(x,0) - x*z + log(1 + exp(-|x|)).
        bce = jnp.maximum(p, 0.0) - p * t + jnp.log(1.0 + jnp.exp(-jnp.abs(p)))
        d = p - t
        sq = d * d

        # Obj flag (0/1), non-zero only on the obj lanes.
        objm = jnp.where(t == 1.0, w_obj, 0.0)

        # Symmetric spread of the flag by +-1 / +-2 lanes (rolls are XLU -> ~free).
        # Regardless of the roll direction convention, the flag of cell k lands on
        # ch1/ch2 of cell k (coord mask) and on ch C-1 / C-2 of the neighbouring
        # cell within the same row (used once, on ch C-1, as the object count).
        r1 = pltpu.roll(objm, shift=1, axis=1)
        r2 = pltpu.roll(objm, shift=2, axis=1)
        r3 = pltpu.roll(objm, shift=lanes - 1, axis=1)
        r4 = pltpu.roll(objm, shift=lanes - 2, axis=1)
        spread = (r1 + r2) + (r3 + r4)

        # Single merged contribution (one accumulator RMW per step).
        contrib = w_obj * bce + spread * (w_coord * sq + w_cnt)
        q = objm * bce  # obj-masked BCE, non-zero only on obj lanes

        if needs_mask:
            # Ragged last row-block: rows past the true extent read garbage; kill them.
            is_tail = (s == num_shards - 1) & (j == steps - 1)
            nvalid = jnp.where(is_tail, last_rows, tile_rows)
            rid = lax.broadcasted_iota(jnp.int32, (tile_rows, lanes), 0)
            valid = rid < nvalid
            contrib = jnp.where(valid, contrib, 0.0)
            q = jnp.where(valid, q, 0.0)

        acc_ref[...] += contrib
        objbce_row_ref[...] += jnp.sum(q, axis=0, keepdims=True)

        @pl.when(j == steps - 1)
        def _finalize():
            # One sublane reduce to a (1, lanes) row, then tiny row reductions.
            rowsum = jnp.sum(acc_ref[...], axis=0, keepdims=True)
            bce_all = jnp.sum(rowsum * w_obj)        # total BCE over all cells
            coord_sse = jnp.sum(rowsum * w_coord)    # obj-masked coord SSE
            num_obj = jnp.sum(rowsum * w_cnt)        # number of object cells
            obj_bce = jnp.sum(objbce_row_ref[...])   # obj-masked BCE

            row = lax.broadcasted_iota(jnp.int32, (8, 128), 0)
            vals = jnp.where(row == 0, obj_bce,
                   jnp.where(row == 1, bce_all - obj_bce,
                   jnp.where(row == 2, coord_sse,
                   jnp.where(row == 3, num_obj, 0.0))))
            out_ref[0, :, :] = vals

    return kernel


def _choose_tile_rows(rows, lanes, in_bytes_per_lane, max_tile_rows):
    """Largest row tile that keeps (2x double-buffered inputs + f32 acc) in budget."""
    per_row = lanes * (2 * in_bytes_per_lane + 4)
    cap = _VMEM_BLOCK_BUDGET // max(per_row, 1)
    cap = max(8, min(int(cap), 1024, int(max_tile_rows)))
    if rows <= cap:
        return rows          # full extent (allowed even if not a multiple of 8)
    return max(8, (cap // 8) * 8)


@functools.partial(
    jax.jit,
    static_argnames=("lambda_coord", "lambda_obj", "lambda_no_obj", "max_tile_rows"))
def yolo_loss(prediction, target, *, lambda_coord, lambda_obj, lambda_no_obj,
              max_tile_rows=1024):
    """Pallas implementation of YoloLoss.forward (reduction='sum')."""
    c = prediction.shape[-1]
    assert c >= 5, "expects a YOLO head with >= 5 channels (obj, x, y, w, h, ...)"

    n = 1
    for dim in prediction.shape[:-1]:
        n *= int(dim)
    lanes = 128 * c

    pred = prediction.reshape(-1, c)   # natural channels-last layout, free reshape
    tgt = target.reshape(-1, c)

    rows = -(-n // 128)                # cdiv
    n_pad = rows * 128
    if n_pad != n:
        # TODO(synk): this pad materializes an HBM copy; it is only hit when the
        # cell count is not 128-aligned (< 128 padded cells, each contributing 0).
        pad = n_pad - n
        pred = jnp.concatenate(
            [pred, jnp.full((pad, c), _PAD_LOGIT, dtype=pred.dtype)], axis=0)
        tgt = jnp.concatenate([tgt, jnp.zeros((pad, c), dtype=tgt.dtype)], axis=0)

    # Lane-dense, channel-interleaved view: lane l holds channel (l % C) of cell (l // C).
    pred2 = pred.reshape(rows, lanes)
    tgt2 = tgt.reshape(rows, lanes)

    in_bytes = pred2.dtype.itemsize + tgt2.dtype.itemsize
    tile_rows = _choose_tile_rows(rows, lanes, in_bytes, max_tile_rows)
    nblocks = -(-rows // tile_rows)
    # Use the 2-wide shard axis only when it divides the block count exactly
    # (no dead grid steps); harmless serial loop on single-TensorCore chips.
    num_shards = 2 if (nblocks % 2 == 0 and nblocks >= 2) else 1
    steps = nblocks // num_shards
    last_rows = rows - (nblocks - 1) * tile_rows   # rows in the final (possibly ragged) block

    kernel = _make_kernel(c, lanes, tile_rows, steps, num_shards, last_rows)

    out = pl.pallas_call(
        kernel,
        out_shape=jax.ShapeDtypeStruct((num_shards, 8, 128), jnp.float32),
        grid_spec=pltpu.PrefetchScalarGridSpec(
            num_scalar_prefetch=0,
            grid=(num_shards, steps),
            in_specs=[
                pl.BlockSpec((tile_rows, lanes), lambda s, j: (s * steps + j, 0)),
                pl.BlockSpec((tile_rows, lanes), lambda s, j: (s * steps + j, 0)),
            ],
            out_specs=pl.BlockSpec((1, 8, 128), lambda s, j: (s, 0, 0)),
            scratch_shapes=[
                pltpu.VMEM((tile_rows, lanes), jnp.float32),  # merged accumulator
                pltpu.VMEM((1, lanes), jnp.float32),          # obj-masked BCE row acc
            ],
        ),
        compiler_params=pltpu.CompilerParams(
            dimension_semantics=("parallel", "arbitrary"),
            vmem_limit_bytes=_VMEM_LIMIT_BYTES,
        ),
    )(pred2, tgt2)

    sums = jnp.sum(out[:, 0:4, 0], axis=0)
    obj_bce_sum = sums[0]
    noobj_bce_sum = sums[1]
    coord_loss = sums[2]
    num_obj = sums[3]

    # Weights use the TRUE cell count (padded cells contribute exactly zero above).
    total_cells = jnp.float32(n)
    num_empty = total_cells - num_obj
    obj_weight = total_cells / (2.0 * num_obj)
    no_obj_weight = total_cells / (2.0 * num_empty)

    object_loss = obj_weight * obj_bce_sum
    no_object_loss = no_obj_weight * noobj_bce_sum
    loss = (lambda_coord * coord_loss
            + lambda_obj * object_loss
            + lambda_no_obj * no_object_loss)
    return loss, coord_loss, object_loss, no_object_loss


def yolo_loss_ref(prediction, target, *, lambda_coord, lambda_obj, lambda_no_obj):
    """Pure-JAX reference mirroring the PyTorch module exactly."""
    obj = target[..., 0] == 1
    no_obj = jnp.logical_not(obj)
    num_obj = jnp.sum(obj)
    num_empty = jnp.sum(no_obj)
    total = (num_obj + num_empty).astype(jnp.float32)
    obj_w = total / (2.0 * num_obj)
    no_obj_w = total / (2.0 * num_empty)

    x = prediction[..., 0].astype(jnp.float32)
    z = target[..., 0].astype(jnp.float32)
    bce = jnp.maximum(x, 0.0) - x * z + jnp.log1p(jnp.exp(-jnp.abs(x)))

    object_loss = obj_w * jnp.sum(jnp.where(obj, bce, 0.0))
    no_object_loss = no_obj_w * jnp.sum(jnp.where(no_obj, bce, 0.0))
    d = prediction[..., 1:3].astype(jnp.float32) - target[..., 1:3].astype(jnp.float32)
    coord_loss = jnp.sum(jnp.where(obj[..., None], d * d, 0.0))
    loss = (lambda_coord * coord_loss
            + lambda_obj * object_loss
            + lambda_no_obj * no_object_loss)
    return loss, coord_loss, object_loss, no_object_loss


def _run_case(key, batch, grid_s, channels, config, max_tile_rows=1024):
    k_pred, k_obj, k_box = jax.random.split(key, 3)
    prediction = jax.random.normal(
        k_pred, (batch, grid_s, grid_s, channels), dtype=jnp.float32)
    obj_mask = (jax.random.uniform(k_obj, (batch, grid_s, grid_s, 1)) < 0.3
                ).astype(jnp.float32)
    boxes = jax.random.uniform(
        k_box, (batch, grid_s, grid_s, channels - 1), dtype=jnp.float32)
    target = jnp.concatenate([obj_mask, boxes], axis=-1)  # channel 0 is exactly 0/1

    got = yolo_loss(prediction, target,
                    lambda_coord=config["lambda_coord"],
                    lambda_obj=config["lambda_obj"],
                    lambda_no_obj=config["lambda_no_obj"],
                    max_tile_rows=max_tile_rows)
    got = jax.block_until_ready(got)

    want = yolo_loss_ref(prediction, target,
                         lambda_coord=config["lambda_coord"],
                         lambda_obj=config["lambda_obj"],
                         lambda_no_obj=config["lambda_no_obj"])
    want = jax.block_until_ready(want)

    for g, w in zip(got, want):
        np.testing.assert_allclose(np.asarray(g), np.asarray(w),
                                   rtol=2e-4, atol=1e-2)


if __name__ == "__main__":
    config = {"lambda_coord": 5.0, "lambda_obj": 1.0, "lambda_no_obj": 0.5}
    key = jax.random.PRNGKey(0)
    keys = jax.random.split(key, 4)

    # 1) Small YOLO-ish shape: batch=2, 16x16 grid, 5 channels (aligned, single block).
    _run_case(keys[0], batch=2, grid_s=16, channels=5, config=config)
    # 2) Non-128-aligned cell count (1x13x13) -> exercises the minimal-pad path.
    _run_case(keys[1], batch=1, grid_s=13, channels=5, config=config)
    # 3) Multi-block + 2-shard split (rows=16, forced tile=8, no ragged tail).
    _run_case(keys[2], batch=8, grid_s=16, channels=5, config=config, max_tile_rows=8)
    # 4) Multi-block + 2-shard split + ragged tail row-block (rows=28, tile=8).
    _run_case(keys[3], batch=14, grid_s=16, channels=5, config=config, max_tile_rows=8)

    print("KERNEL_OK")
</pallas_src>

<mosaic_0001>
module attributes {stable_mosaic.version = 11 : i64} {
  func.func @kernel(%arg0: i32, %arg1: i32, %arg2: memref<4x640xf32, #tpu.memory_space<vmem>>, %arg3: memref<4x640xf32, #tpu.memory_space<vmem>>, %arg4: memref<1x8x128xf32, #tpu.memory_space<vmem>>, %arg5: memref<4x640xf32, #tpu.memory_space<vmem>>, %arg6: memref<1x640xf32, #tpu.memory_space<vmem>>) attributes {dimension_semantics = [#tpu.dimension_semantics<parallel>, #tpu.dimension_semantics<arbitrary>], iteration_bounds = array<i64: 1, 1>, scalar_prefetch = 0 : i64, scratch_operands = 2 : i64, tpu.core_type = #tpu.core_type<tc>, window_params = [{transform_indices = @transform_0, window_bounds = array<i64: 4, 640>}, {transform_indices = @transform_1, window_bounds = array<i64: 4, 640>}, {transform_indices = @transform_2, window_bounds = array<i64: 1, 8, 128>}]} {
    %c0_i32 = arith.constant 0 : i32
    %0 = arith.cmpi eq, %arg1, %c0_i32 : i32
    %1 = arith.extui %0 : i1 to i32
    %c0_i32_0 = arith.constant 0 : i32
    %2 = arith.cmpi ne, %1, %c0_i32_0 : i32
    scf.if %2 {
      %cst_27 = arith.constant 0.000000e+00 : f32
      %84 = vector.broadcast %cst_27 : f32 to vector<4x640xf32>
      %c0_28 = arith.constant 0 : index
      %c0_29 = arith.constant 0 : index
      %85 = vector.load %arg5[%c0_28, %c0_29] : memref<4x640xf32, #tpu.memory_space<vmem>>, vector<4x640xf32>
      tpu.vector_store %arg5[%c0_28, %c0_29], %84 {strides = array<i32>} : memref<4x640xf32, #tpu.memory_space<vmem>>, vector<4x640xf32>,
      %cst_30 = arith.constant 0.000000e+00 : f32
      %86 = vector.broadcast %cst_30 : f32 to vector<1x640xf32>
      %c0_31 = arith.constant 0 : index
      %c0_32 = arith.constant 0 : index
      %87 = vector.load %arg6[%c0_31, %c0_32] : memref<1x640xf32, #tpu.memory_space<vmem>>, vector<1x640xf32>
      tpu.vector_store %arg6[%c0_31, %c0_32], %86 {strides = array<i32>} : memref<1x640xf32, #tpu.memory_space<vmem>>, vector<1x640xf32>,
    } else {
    }
    %c0 = arith.constant 0 : index
    %c0_1 = arith.constant 0 : index
    %3 = vector.load %arg2[%c0, %c0_1] : memref<4x640xf32, #tpu.memory_space<vmem>>, vector<4x640xf32>
    %c0_2 = arith.constant 0 : index
    %c0_3 = arith.constant 0 : index
    %4 = vector.load %arg3[%c0_2, %c0_3] : memref<4x640xf32, #tpu.memory_space<vmem>>, vector<4x640xf32>
    %5 = tpu.iota {dimensions = array<i32: 1>} : vector<1x640xi32>
    %c5_i32 = arith.constant 5 : i32
    %c0_i32_4 = arith.constant 0 : i32
    %6 = arith.cmpi eq, %c5_i32, %c0_i32_4 : i32
    %c1_i32 = arith.constant 1 : i32
    %7 = arith.select %6, %c1_i32, %c5_i32 : i32
    %8 = vector.broadcast %7 : i32 to vector<1x640xi32>
    %9 = arith.remsi %5, %8 : vector<1x640xi32>
    %c0_i32_5 = arith.constant 0 : i32
    %10 = vector.broadcast %c0_i32_5 : i32 to vector<1x640xi32>
    %11 = arith.cmpi ne, %9, %10 : vector<1x640xi32>
    %c0_i32_6 = arith.constant 0 : i32
    %12 = vector.broadcast %c0_i32_6 : i32 to vector<1x640xi32>
    %13 = arith.cmpi slt, %9, %12 : vector<1x640xi32>
    %c0_i32_7 = arith.constant 0 : i32
    %14 = arith.cmpi slt, %7, %c0_i32_7 : i32
    %15 = vector.broadcast %14 : i1 to vector<1x640xi1>
    %16 = vector.broadcast %15 : vector<1x640xi1> to vector<1x640xi1>
    %17 = arith.xori %13, %16 : vector<1x640xi1>
    %18 = arith.andi %17, %11 : vector<1x640xi1>
    %19 = vector.broadcast %7 : i32 to vector<1x640xi32>
    %20 = arith.addi %9, %19 : vector<1x640xi32>
    %21 = arith.select %18, %20, %9 : vector<1x640xi1>, vector<1x640xi32>
    %c0_i32_8 = arith.constant 0 : i32
    %22 = vector.broadcast %c0_i32_8 : i32 to vector<1x640xi32>
    %23 = arith.cmpi eq, %21, %22 : vector<1x640xi32>
    %24 = arith.extui %23 : vector<1x640xi1> to vector<1x640xi32>
    %25 = arith.sitofp %24 : vector<1x640xi32> to vector<1x640xf32>
    %c1_i32_9 = arith.constant 1 : i32
    %26 = vector.broadcast %c1_i32_9 : i32 to vector<1x640xi32>
    %27 = arith.cmpi eq, %21, %26 : vector<1x640xi32>
    %c2_i32 = arith.constant 2 : i32
    %28 = vector.broadcast %c2_i32 : i32 to vector<1x640xi32>
    %29 = arith.cmpi eq, %21, %28 : vector<1x640xi32>
    %30 = arith.ori %27, %29 : vector<1x640xi1>
    %31 = arith.extui %30 : vector<1x640xi1> to vector<1x640xi32>
    %32 = arith.sitofp %31 : vector<1x640xi32> to vector<1x640xf32>
    %c4_i32 = arith.constant 4 : i32
    %33 = vector.broadcast %c4_i32 : i32 to vector<1x640xi32>
    %34 = arith.cmpi eq, %21, %33 : vector<1x640xi32>
    %35 = arith.extui %34 : vector<1x640xi1> to vector<1x640xi32>
    %36 = arith.sitofp %35 : vector<1x640xi32> to vector<1x640xf32>
    %cst = arith.constant 0.000000e+00 : f32
    %37 = vector.broadcast %cst : f32 to vector<4x640xf32>
    %38 = arith.maximumf %3, %37 : vector<4x640xf32>
    %39 = arith.mulf %3, %4 : vector<4x640xf32>
    %40 = arith.subf %38, %39 : vector<4x640xf32>
    %41 = math.absf %3 : vector<4x640xf32>
    %cst_10 = arith.constant 0.000000e+00 : f32
    %42 = vector.broadcast %cst_10 : f32 to vector<4x640xf32>
    %43 = arith.subf %42, %41 : vector<4x640xf32>
    %44 = math.exp %43 : vector<4x640xf32>
    %cst_11 = arith.constant 1.000000e+00 : f32
    %45 = vector.broadcast %cst_11 : f32 to vector<4x640xf32>
    %46 = arith.addf %45, %44 : vector<4x640xf32>
    %47 = math.log %46 : vector<4x640xf32>
    %48 = arith.addf %40, %47 : vector<4x640xf32>
    %49 = arith.subf %3, %4 : vector<4x640xf32>
    %50 = arith.mulf %49, %49 : vector<4x640xf32>
    %cst_12 = arith.constant 1.000000e+00 : f32
    %51 = vector.broadcast %cst_12 : f32 to vector<4x640xf32>
    %52 = arith.cmpf oeq, %4, %51 : vector<4x640xf32>
    %cst_13 = arith.constant 0.000000e+00 : f32
    %53 = vector.shape_cast %25 : vector<1x640xf32> to vector<1x640xf32>
    %54 = vector.broadcast %53 : vector<1x640xf32> to vector<4x640xf32>
    %55 = vector.broadcast %cst_13 : f32 to vector<4x640xf32>
    %56 = arith.select %52, %54, %55 : vector<4x640xi1>, vector<4x640xf32>
    %c1_i32_14 = arith.constant 1 : i32
    %57 = tpu.dynamic_rotate %56 by %c1_i32_14 dim 1 : vector<4x640xf32>, i32 -> vector<4x640xf32>
    %c2_i32_15 = arith.constant 2 : i32
    %58 = tpu.dynamic_rotate %56 by %c2_i32_15 dim 1 : vector<4x640xf32>, i32 -> vector<4x640xf32>
    %c639_i32 = arith.constant 639 : i32
    %59 = tpu.dynamic_rotate %56 by %c639_i32 dim 1 : vector<4x640xf32>, i32 -> vector<4x640xf32>
    %c638_i32 = arith.constant 638 : i32
    %60 = tpu.dynamic_rotate %56 by %c638_i32 dim 1 : vector<4x640xf32>, i32 -> vector<4x640xf32>
    %61 = arith.addf %57, %58 : vector<4x640xf32>
    %62 = arith.addf %59, %60 : vector<4x640xf32>
    %63 = arith.addf %61, %62 : vector<4x640xf32>
    %64 = vector.broadcast %25 : vector<1x640xf32> to vector<4x640xf32>
    %65 = arith.mulf %64, %48 : vector<4x640xf32>
    %66 = vector.broadcast %32 : vector<1x640xf32> to vector<4x640xf32>
    %67 = arith.mulf %66, %50 : vector<4x640xf32>
    %68 = vector.broadcast %36 : vector<1x640xf32> to vector<4x640xf32>
    %69 = arith.addf %67, %68 : vector<4x640xf32>
    %70 = arith.mulf %63, %69 : vector<4x640xf32>
    %71 = arith.addf %65, %70 : vector<4x640xf32>
    %72 = arith.mulf %56, %48 : vector<4x640xf32>
    %c0_16 = arith.constant 0 : index
    %c0_17 = arith.constant 0 : index
    %73 = vector.load %arg5[%c0_16, %c0_17] : memref<4x640xf32, #tpu.memory_space<vmem>>, vector<4x640xf32>
    %74 = arith.addf %73, %71 : vector<4x640xf32>
    %c0_18 = arith.constant 0 : index
    %c0_19 = arith.constant 0 : index
    %75 = vector.load %arg5[%c0_18, %c0_19] : memref<4x640xf32, #tpu.memory_space<vmem>>, vector<4x640xf32>
    tpu.vector_store %arg5[%c0_18, %c0_19], %74 {strides = array<i32>} : memref<4x640xf32, #tpu.memory_space<vmem>>, vector<4x640xf32>,
    %c0_20 = arith.constant 0 : index
    %c0_21 = arith.constant 0 : index
    %76 = vector.load %arg6[%c0_20, %c0_21] : memref<1x640xf32, #tpu.memory_space<vmem>>, vector<1x640xf32>
    %cst_22 = arith.constant dense<0.000000e+00> : vector<640xf32>
    %77 = vector.multi_reduction <add>, %72, %cst_22 [0] : vector<4x640xf32> to vector<640xf32>
    %78 = vector.shape_cast %77 : vector<640xf32> to vector<1x640xf32>
    %79 = arith.addf %76, %78 : vector<1x640xf32>
    %c0_23 = arith.constant 0 : index
    %c0_24 = arith.constant 0 : index
    %80 = vector.load %arg6[%c0_23, %c0_24] : memref<1x640xf32, #tpu.memory_space<vmem>>, vector<1x640xf32>
    tpu.vector_store %arg6[%c0_23, %c0_24], %79 {strides = array<i32>} : memref<1x640xf32, #tpu.memory_space<vmem>>, vector<1x640xf32>,
    %c0_i32_25 = arith.constant 0 : i32
    %81 = arith.cmpi eq, %arg1, %c0_i32_25 : i32
    %82 = arith.extui %81 : i1 to i32
    %c0_i32_26 = arith.constant 0 : i32
    %83 = arith.cmpi ne, %82, %c0_i32_26 : i32
    scf.if %83 {
      %c0_27 = arith.constant 0 : index
      %c0_28 = arith.constant 0 : index
      %84 = vector.load %arg5[%c0_27, %c0_28] : memref<4x640xf32, #tpu.memory_space<vmem>>, vector<4x640xf32>
      %cst_29 = arith.constant dense<0.000000e+00> : vector<640xf32>
      %85 = vector.multi_reduction <add>, %84, %cst_29 [0] : vector<4x640xf32> to vector<640xf32>
      %86 = vector.shape_cast %85 : vector<640xf32> to vector<1x640xf32>
      %87 = arith.mulf %86, %25 : vector<1x640xf32>
      %88 = vector.shape_cast %87 : vector<1x640xf32> to vector<1x1x640xf32>
      %cst_30 = arith.constant dense<0.000000e+00> : vector<1xf32>
      %89 = vector.multi_reduction <add>, %88, %cst_30 [1, 2] : vector<1x1x640xf32> to vector<1xf32>
      %90 = vector.shape_cast %89 : vector<1xf32> to vector<1x1x1xf32>
      %91 = vector.extract %90[0, 0, 0] : f32 from vector<1x1x1xf32>
      %92 = arith.mulf %86, %32 : vector<1x640xf32>
      %93 = vector.shape_cast %92 : vector<1x640xf32> to vector<1x1x640xf32>
      %cst_31 = arith.constant dense<0.000000e+00> : vector<1xf32>
      %94 = vector.multi_reduction <add>, %93, %cst_31 [1, 2] : vector<1x1x640xf32> to vector<1xf32>
      %95 = vector.shape_cast %94 : vector<1xf32> to vector<1x1x1xf32>
      %96 = vector.extract %95[0, 0, 0] : f32 from vector<1x1x1xf32>
      %97 = arith.mulf %86, %36 : vector<1x640xf32>
      %98 = vector.shape_cast %97 : vector<1x640xf32> to vector<1x1x640xf32>
      %cst_32 = arith.constant dense<0.000000e+00> : vector<1xf32>
      %99 = vector.multi_reduction <add>, %98, %cst_32 [1, 2] : vector<1x1x640xf32> to vector<1xf32>
      %100 = vector.shape_cast %99 : vector<1xf32> to vector<1x1x1xf32>
      %101 = vector.extract %100[0, 0, 0] : f32 from vector<1x1x1xf32>
      %c0_33 = arith.constant 0 : index
      %c0_34 = arith.constant 0 : index
      %102 = vector.load %arg6[%c0_33, %c0_34] : memref<1x640xf32, #tpu.memory_space<vmem>>, vector<1x640xf32>
      %103 = vector.shape_cast %102 : vector<1x640xf32> to vector<1x1x640xf32>
      %cst_35 = arith.constant dense<0.000000e+00> : vector<1xf32>
      %104 = vector.multi_reduction <add>, %103, %cst_35 [1, 2] : vector<1x1x640xf32> to vector<1xf32>
      %105 = vector.shape_cast %104 : vector<1xf32> to vector<1x1x1xf32>
      %106 = vector.extract %105[0, 0, 0] : f32 from vector<1x1x1xf32>
      %107 = tpu.iota {dimensions = array<i32: 0>} : vector<8x128xi32>
      %c0_i32_36 = arith.constant 0 : i32
      %108 = vector.broadcast %c0_i32_36 : i32 to vector<8x128xi32>
      %109 = arith.cmpi eq, %107, %108 : vector<8x128xi32>
      %c1_i32_37 = arith.constant 1 : i32
      %110 = vector.broadcast %c1_i32_37 : i32 to vector<8x128xi32>
      %111 = arith.cmpi eq, %107, %110 : vector<8x128xi32>
      %112 = arith.subf %91, %106 : f32
      %c2_i32_38 = arith.constant 2 : i32
      %113 = vector.broadcast %c2_i32_38 : i32 to vector<8x128xi32>
      %114 = arith.cmpi eq, %107, %113 : vector<8x128xi32>
      %c3_i32 = arith.constant 3 : i32
      %115 = vector.broadcast %c3_i32 : i32 to vector<8x128xi32>
      %116 = arith.cmpi eq, %107, %115 : vector<8x128xi32>
      %cst_39 = arith.constant 0.000000e+00 : f32
      %117 = vector.broadcast %101 : f32 to vector<8x128xf32>
      %118 = vector.broadcast %cst_39 : f32 to vector<8x128xf32>
      %119 = arith.select %116, %117, %118 : vector<8x128xi1>, vector<8x128xf32>
      %120 = vector.broadcast %96 : f32 to vector<8x128xf32>
      %121 = arith.select %114, %120, %119 : vector<8x128xi1>, vector<8x128xf32>
      %122 = vector.broadcast %112 : f32 to vector<8x128xf32>
      %123 = arith.select %111, %122, %121 : vector<8x128xi1>, vector<8x128xf32>
      %124 = vector.broadcast %106 : f32 to vector<8x128xf32>
      %125 = arith.select %109, %124, %123 : vector<8x128xi1>, vector<8x128xf32>
      %c0_40 = arith.constant 0 : index
      %c0_41 = arith.constant 0 : index
      %c0_42 = arith.constant 0 : index
      %126 = vector.load %arg4[%c0_40, %c0_41, %c0_42] : memref<1x8x128xf32, #tpu.memory_space<vmem>>, vector<1x8x128xf32>
      %127 = vector.shape_cast %126 : vector<1x8x128xf32> to vector<8x128xf32>
      %128 = vector.shape_cast %125 : vector<8x128xf32> to vector<1x8x128xf32>
      tpu.vector_store %arg4[%c0_40, %c0_41, %c0_42], %128 {strides = array<i32>} : memref<1x8x128xf32, #tpu.memory_space<vmem>>, vector<1x8x128xf32>,
    } else {
    }
    return
  }
  func.func @transform_0(%arg0: i32, %arg1: i32) -> (i32, i32) {
    %c1_i32 = arith.constant 1 : i32
    %0 = arith.muli %arg0, %c1_i32 : i32
    %1 = arith.addi %0, %arg1 : i32
    %c0_i32 = arith.constant 0 : i32
    %c0_i32_0 = arith.constant 0 : i32
    return %1, %c0_i32 : i32, i32
  }
  func.func @transform_1(%arg0: i32, %arg1: i32) -> (i32, i32) {
    %c1_i32 = arith.constant 1 : i32
    %0 = arith.muli %arg0, %c1_i32 : i32
    %1 = arith.addi %0, %arg1 : i32
    %c0_i32 = arith.constant 0 : i32
    %c0_i32_0 = arith.constant 0 : i32
    return %1, %c0_i32 : i32, i32
  }
  func.func @transform_2(%arg0: i32, %arg1: i32) -> (i32, i32, i32) {
    %c0_i32 = arith.constant 0 : i32
    %c0_i32_0 = arith.constant 0 : i32
    %c0_i32_1 = arith.constant 0 : i32
    return %arg0, %c0_i32, %c0_i32_0 : i32, i32, i32
  }
}

</mosaic_0001>

<bundles_post_ra>
// kernel: yolo_loss.1
= control target key start
LH: loop header
LB: loop body
LE: loop exit
PB: predicated region body
PF: predicated region fallthrough
CT: control target
= control target key end

     0   :  { %v58_v0 = vlaneseq  ;;  %v766_v2 = vmov 0.0   ;;  %s767_s18 = smov 127   ;;  %s769_s21 = smov 1   ;;  %s1173_s0 = inlined_call_operand.vmem [shape: f32[4,640], index: 0, kind: input, shape index: {}]   ;;  %s1174_s1 = inlined_call_operand.vmem [shape: f32[4,640], index: 1, kind: input, shape index: {}]   ;;  %s1175_s2 = inlined_call_operand.vmem [shape: f32[1,8,128], index: 2, kind: output, shape index: {}]  }
   0x1   :  { %v790_v1 = vld [vmem:[%s1173_s0] sm:$0xff]  ;;  %57 = vst [vmem:[#allocation2 + $0x10] sm:$0xf] %v766_v2  ;;  %v799_v4 = vld [vmem:[%s1173_s0 + $0x8] sm:$0xff]  ;;  %v804_v5 = vld [vmem:[%s1173_s0 + $0x10] sm:$0xf] }
   0x2   :  { %v794_v3 = vand.u32 127, %v58_v0  ;;  %v219_v7 = vand.u32 2147483647, %v790_v1  ;;  %v220_v8 = vand.u32 2147483647, %v799_v4  ;;  %v844_v42 = vld [vmem:[%s1174_s1] sm:$0xff] }
   0x3   :  { %v221_v9 = vand.u32 2147483647, %v804_v5  ;;  %v831_v27 = vld [vmem:[%s1174_s1 + $0x10] sm:$0xf]  ;;  %vm249_vm11 = vcmp.eq.f32.partialorder %v844_v42, 1.0  ;;  %v874_v63 = vld [vmem:[%s1174_s1 + $0x8] sm:$0xff] }
   0x4   :  { %v74_v6 = vadd.s32 512, %v794_v3  ;;  %v71_v10 = vadd.s32 128, %v794_v3  ;;  %v815_v13 = vmul.u32.u64.low 3435973837, %v794_v3  ;;  %v816_v14 = vmul.u32.u64.high 3435973837, %v794_v3, %v815_v13  ;;  %s768_s1 = smov 2   ;;  %s770_s22 = smov 126  }
   0x5   :  { %v224_v15 = vsub.f32 0.0, %v221_v9  ;;  %v72_v18 = vadd.s32 256, %v794_v3  ;;  %v73_v19 = vadd.s32 384, %v794_v3  ;;  %v222_v21 = vsub.f32 0.0, %v219_v7 }
   0x6   :  { %v811_v11 = vmul.u32.u64.low 3435973837, %v74_v6  ;;  %v812_v12 = vmul.u32.u64.high 3435973837, %v74_v6, %v811_v11  ;;  %v818_v16 = vmul.u32.u64.low 3435973837, %v71_v10  ;;  %v819_v17 = vmul.u32.u64.high 3435973837, %v71_v10, %v818_v16 }
   0x7   :  { %v229_v20 = vmul.f32 1.442695, %v224_v15  ;;  %v223_v22 = vsub.f32 0.0, %v220_v8  ;;  %v81_v24 = vshrl.u32 %v816_v14, 2  ;;  %v225_v33 = vmul.f32 1.442695, %v222_v21 }
   0x8   :  { %v125_v23 = vshrl.u32 %v812_v12, 2  ;;  %v825_v25 = vmul.u32.u64.low 3435973837, %v72_v18  ;;  %v826_v26 = vmul.u32.u64.high 3435973837, %v72_v18, %v825_v25  ;;  %v92_v28 = vshrl.u32 %v819_v17, 2 }
   0x9   :  { %752 = vpow2.f32 %v229_v20  ;;  %v834_v29 = vmul.u32.u64.low 3435973837, %v73_v19  ;;  %v835_v30 = vmul.u32.u64.high 3435973837, %v73_v19, %v834_v29  ;;  %v82_v32 = vmul.u32 5, %v81_v24 }
   0xa   :  { %v126_v31 = vmul.u32 5, %v125_v23  ;;  %v227_v34 = vmul.f32 1.442695, %v223_v22  ;;  %v93_v35 = vmul.u32 5, %v92_v28  ;;  %v103_v38 = vshrl.u32 %v826_v26, 2 }
   0xb   :  { %v83_v37 = vsub.s32 %v794_v3, %v82_v32  ;;  %754 = vpow2.f32 %v225_v33  ;;  %vm251_vm0 = vcmp.eq.f32.partialorder %v831_v27, 1.0  ;;  %v114_v40 = vshrl.u32 %v835_v30, 2 }
   0xc   :  { %v127_v36 = vsub.s32 %v74_v6, %v126_v31  ;;  %v94_v39 = vsub.s32 %v71_v10, %v93_v35  ;;  %756 = vpow2.f32 %v227_v34  ;;  %v104_v46 = vmul.u32 5, %v103_v38 }
   0xd   :  { %vm130_vm3 = vcmp.ne.s32.totalorder %v83_v37, 0  ;;  %vm135_vm6 = vcmp.lt.s32.totalorder %v83_v37, 0  ;;  %v145_v43 = vadd.s32 5, %v83_v37  ;;  %v115_v47 = vmul.u32 5, %v114_v40 }
   0xe   :  { %vm134_vm1 = vcmp.ne.s32.totalorder %v127_v36, 0  ;;  %vm139_vm2 = vcmp.lt.s32.totalorder %v127_v36, 0  ;;  %v149_v41 = vadd.s32 5, %v127_v36  ;;  %vm131_vm5 = vcmp.ne.s32.totalorder %v94_v39, 0  ;;  %vm140_vm8 = vmand %vm135_vm6, %vm130_vm3 }
   0xf   :  { %vm144_vm4 = vmand %vm139_vm2, %vm134_vm1  ;;  %vm136_vm7 = vcmp.lt.s32.totalorder %v94_v39, 0  ;;  %v146_v45 = vadd.s32 5, %v94_v39  ;;  %v150_v48 = vsel %vm140_vm8, %v145_v43, %v83_v37  ;;  %v105_v51 = vsub.s32 %v72_v18, %v104_v46 }
  0x10   :  { %v846_v44 = vsel %vm144_vm4, %v149_v41, %v127_v36  ;;  %vm141_vm10 = vmand %vm136_vm7, %vm131_vm5  ;;  %vm155_vm12 = vcmp.eq.s32.totalorder %v150_v48, 0  ;;  %v116_v55 = vsub.s32 %v73_v19, %v115_v47  ;;  %vm170_vm6 = vcmp.eq.s32.totalorder %v150_v48, 1 }
  0x11   :  { %vm159_vm9 = vcmp.eq.s32.totalorder %v846_v44, 0  ;;  %v853_v50 = vsel %vm141_vm10, %v146_v45, %v94_v39  ;;  %v862_v54 = vsel %vm155_vm12, 1.0, %v766_v2  ;;  %vm132_vm14 = vcmp.ne.s32.totalorder %v105_v51, 0 }
  0x12   :  { %v851_v49 = vsel %vm159_vm9, 1.0, %v766_v2  ;;  %vm156_vm13 = vcmp.eq.s32.totalorder %v853_v50, 0  ;;  %vm137_vm15 = vcmp.lt.s32.totalorder %v105_v51, 0  ;;  %vm138_vm1 = vcmp.lt.s32.totalorder %v116_v55, 0 }
  0x13   :  { %v753_v52 = vpop.eup %752  ;;  %v858_v53 = vsel %vm251_vm0, %v851_v49, 0.0  ;;  %v867_v57 = vsel %vm156_vm13, 1.0, %v766_v2  ;;  %vm133_vm0 = vcmp.ne.s32.totalorder %v116_v55, 0  ;;  %vm142_vm2 = vmand %vm137_vm15, %vm132_vm14  ;;  %v147_v59 = vadd.s32 5, %v105_v51 }
  0x14   :  { %309 = vrot.lane.b32.xlu1 %v858_v53, %s767_s18  ;;  %v233_v56 = vadd.f32 1.0, %v753_v52  ;;  %v256_v58 = vcombine.low %v862_v54, %v867_v57  ;;  %vm143_vm3 = vmand %vm138_vm1, %vm133_vm0  ;;  %v148_v61 = vadd.s32 5, %v116_v55  ;;  %vm175_vm7 = vcmp.eq.s32.totalorder %v150_v48, 2 }
  0x15   :  { %v755_v60 = vpop.eup %754  ;;  %v880_v7 = vsel %vm142_vm2, %v147_v59, %v105_v51  ;;  %vm250_vm8 = vcmp.eq.f32.partialorder %v874_v63, 1.0  ;;  %vm180_vm9 = vmor %vm170_vm6, %vm175_vm7  ;;  %v212_v14 = vmax.f32 %v804_v5, 0.0  ;;  %v215_v15 = vmul.f32 %v831_v27, %v804_v5 }
  0x16   :  { %758 = vlog2.f32 %v233_v56  ;;  %v757_v62 = vpop.eup %756  ;;  %v878_v6 = vsel %vm249_vm11, %v256_v58, 0.0  ;;  %v231_v8 = vadd.f32 1.0, %v755_v60  ;;  %v884_v10 = vsel %vm143_vm3, %v148_v61, %v116_v55 }
  0x17   :  { %v737_v9 = vpack.i.bf16 %v858_v53, %v878_v6  ;;  %vm157_vm4 = vcmp.eq.s32.totalorder %v880_v7, 0  ;;  %vm158_vm5 = vcmp.eq.s32.totalorder %v884_v10, 0  ;;  %v899_v13 = vcombine.high %v878_v6, %v878_v6 }
  0x18   :  { %v889_v11 = vsel %vm157_vm4, 1.0, %v766_v2  ;;  %v894_v12 = vsel %vm158_vm5, 1.0, %v766_v2  ;;  %760 = vlog2.f32 %v231_v8  ;;  %vm195_vm10 = vcmp.eq.s32.totalorder %v150_v48, 4 }
  0x19   :  { %738 = vrot.lane.b32.xlu1 %v737_v9, %s768_s1  ;;  %733 = vrot.lane.b32.xlu0 %v737_v9, %s769_s21  ;;  %v257_v16 = vcombine.low %v889_v11, %v894_v12  ;;  %v243_v17 = vsub.f32 %v790_v1, %v844_v42  ;;  %v232_v18 = vadd.f32 1.0, %v757_v62  ;;  %v911_v20 = vsel %vm180_vm9, 1.0, %v766_v2 }
  0x1a   :  { %v218_v23 = vsub.f32 %v212_v14, %v215_v15  ;;  %v918_v24 = vsel %vm195_vm10, 1.0, %v766_v2  ;;  %v213_v26 = vmul.f32 %v844_v42, %v790_v1  ;;  %v210_v28 = vmax.f32 %v790_v1, 0.0 }
  0x1b   :  { %v908_v19 = vsel %vm250_vm8, %v257_v16, 0.0  ;;  %v246_v22 = vmul.f32 %v243_v17, %v243_v17  ;;  %762 = vlog2.f32 %v232_v18  ;;  %vm171_vm11 = vcmp.eq.s32.totalorder %v853_v50, 1 }
  0x1c   :  { %v742_v21 = vpack.i.bf16 %v908_v19, %v878_v6  ;;  %vm176_vm12 = vcmp.eq.s32.totalorder %v853_v50, 2  ;;  %vm196_vm14 = vcmp.eq.s32.totalorder %v853_v50, 4  ;;  %vm412_vm15 = vcmask 1043456  }
  0x1d   :  { %287 = vrot.lane.b32.xlu1 %v899_v13, %s768_s1  ;;  %v365_v29 = vmul.f32 %v911_v20, %v246_v22  ;;  %vm181_vm13 = vmor %vm171_vm11, %vm176_vm12  ;;  %v361_v32 = vcombine.high %v246_v22, %v246_v22  ;;  %v939_v34 = vsel %vm196_vm14, 1.0, %v766_v2  ;;  %v214_v35 = vmul.f32 %v874_v63, %v799_v4 }
  0x1e   :  { %743 = vrot.lane.b32.xlu0 %v742_v21, %s767_s18  ;;  %v936_v1 = vsel %vm181_vm13, 1.0, %v766_v2  ;;  %v216_v36 = vsub.f32 %v210_v28, %v213_v26  ;;  %v245_v38 = vsub.f32 %v804_v5, %v831_v27  ;;  %v951_v41 = vcombine.high %v908_v19, %v908_v19 }
  0x1f   :  { %v930_v31 = vadd.f32 %v918_v24, %v365_v29  ;;  %v366_v37 = vmul.f32 %v936_v1, %v361_v32  ;;  %vm174_vm0 = vcmp.eq.s32.totalorder %v846_v44, 1  ;;  %vm179_vm1 = vcmp.eq.s32.totalorder %v846_v44, 2 }
  0x20   :  { %v759_v25 = vpop.eup %758  ;;  %v211_v5 = vmax.f32 %v799_v4, 0.0  ;;  %v244_v27 = vsub.f32 %v799_v4, %v874_v63  ;;  %vm184_vm2 = vmor %vm174_vm0, %vm179_vm1  ;;  %vm172_vm3 = vcmp.eq.s32.totalorder %v880_v7, 1  ;;  %vm173_vm4 = vcmp.eq.s32.totalorder %v884_v10, 1 }
  0x21   :  { %v239_v30 = vmul.f32 0.6931472, %v759_v25  ;;  %303 = vrot.lane.b32.xlu1 %v899_v13, %s767_s18  ;;  %v958_v43 = vadd.f32 %v939_v34, %v366_v37  ;;  %vm177_vm5 = vcmp.eq.s32.totalorder %v880_v7, 2  ;;  %vm178_vm6 = vcmp.eq.s32.totalorder %v884_v10, 2 }
  0x22   :  { %748 = vrot.lane.b32.xlu0 %v742_v21, %s770_s22  ;;  %v761_v39 = vpop.eup %760  ;;  %v247_v48 = vmul.f32 %v244_v27, %v244_v27  ;;  %vm182_vm7 = vmor %vm172_vm3, %vm177_vm5  ;;  %v217_v51 = vsub.f32 %v211_v5, %v214_v35  ;;  %v977_v55 = vsel %vm184_vm2, 1.0, %v766_v2  ;;  %vm199_vm9 = vcmp.eq.s32.totalorder %v846_v44, 4 }
  0x23   :  { %v933_v33 = vadd.f32 %v239_v30, %v218_v23  ;;  %v235_v42 = vmul.f32 0.6931472, %v761_v39  ;;  %vm183_vm8 = vmor %vm173_vm4, %vm178_vm6  ;;  %v248_v56 = vmul.f32 %v245_v38, %v245_v38  ;;  %v984_v60 = vsel %vm182_vm7, 1.0, %v766_v2 }
  0x24   :  { %v362_v61 = vcombine.high %v247_v48, %v247_v48  ;;  %v987_v63 = vsel %vm183_vm8, 1.0, %v766_v2  ;;  %vm197_vm10 = vcmp.eq.s32.totalorder %v880_v7, 4  ;;  %vm198_vm11 = vcmp.eq.s32.totalorder %v884_v10, 4 }
  0x25   :  { %v387_v40 = vmul.f32 %v858_v53, %v933_v33  ;;  %319 = vrot.lane.b32.xlu1 %v899_v13, %s770_s22  ;;  %v763_v46 = vpop.eup %762  ;;  %v966_v47 = vadd.f32 %v235_v42, %v216_v36  ;;  %v995_v9 = vsel %vm197_vm10, 1.0, %v766_v2  ;;  %v998_v14 = vsel %vm198_vm11, 1.0, %v766_v2 }
  0x26   :  { %273 = vrot.lane.b32.xlu0 %v908_v19, %s769_s21  ;;  %v237_v52 = vmul.f32 0.6931472, %v763_v46  ;;  %v367_v7 = vmul.f32 %v984_v60, %v247_v48  ;;  %vm1006_vm12 = vcmp.lt.s32.totalorder %v58_v0, 640  ;;  %v368_v18 = vmul.f32 %v987_v63, %v362_v61 }
  0x27   :  { %v441_v45 = vsel %vm412_vm15, %v387_v40, 0.0  ;;  %v385_v4 = vmul.f32 %v878_v6, %v966_v47  ;;  %v1014_v21 = vsel %vm199_vm9, 1.0, %v766_v2  ;;  %v369_v22 = vmul.f32 %v977_v55, %v248_v56  ;;  %62 = vst.msk [vmem:[#allocation3] sm:$0x1f] %vm1006_vm12, %v766_v2 }
  0x28   :  { %v442_v50 = vrot.slane %v441_v45, 4  ;;  %v1000_v17 = vadd.f32 %v237_v52, %v217_v51  ;;  %v1023_v26 = vadd.f32 %v995_v9, %v367_v7  ;;  %v1026_v28 = vadd.f32 %v998_v14, %v368_v18 }
  0x29   :  { %275 = vrot.lane.b32.xlu1 %v951_v41, %s769_s21  ;;  %v408_v58 = vcombine.high %v385_v4, %v385_v4  ;;  %v413_v59 = vsel %vm412_vm15, %v385_v4, 0.0  ;;  %v1031_v32 = vadd.f32 %v1014_v21, %v369_v22  ;;  %v771_v37 = vmov 1966171168  }
  0x2a   :  { %289 = vrot.lane.b32.xlu0 %v908_v19, %s768_s1  ;;  %v414_v62 = vrot.slane %v413_v59, 4  ;;  %v443_v6 = vadd.f32 %v442_v50, %v441_v45  ;;  %v386_v44 = vmul.f32 %v908_v19, %v1000_v17  ;;  %v456_v38 = vunpack.c.l.s4 %v771_v37 }
  0x2b   :  { %v420_v8 = vsel %vm412_vm15, %v408_v58, 0.0  ;;  %v1040_v50 = vshrl.u32 %v58_v0, 7  ;;  %vm295_vm13 = vcmp.lt.s32.totalorder %v794_v3, 2  ;;  %vm279_vm14 = vcmp.lt.s32.totalorder %v794_v3, 1 }
  0x2c   :  { %v415_v15 = vadd.f32 %v414_v62, %v413_v59  ;;  %v421_v16 = vrot.slane %v420_v8, 4  ;;  %v409_v2 = vcombine.high %v386_v44, %v386_v44  ;;  %v457_v48 = vunpack.c.0.s8 %v456_v38 }
  0x2d   :  { %291 = vrot.lane.b32.xlu1 %v951_v41, %s768_s1  ;;  %vm327_vm0 = vcmp.lt.s32.totalorder %v794_v3, 126  ;;  %vm311_vm1 = vcmp.lt.s32.totalorder %v794_v3, 127  ;;  %vm551_vm2 = vcmask 1040384   ;;  %vm666_vm3 = vcmp.eq.s32.totalorder %v1040_v50, 2 }
  0x2e   :  { %271 = vrot.lane.b32.xlu0 %v899_v13, %s769_s21  ;;  %v416_v23 = vrot.slane %v415_v15, 2  ;;  %v422_v25 = vadd.f32 %v421_v16, %v420_v8  ;;  %v444_v13 = vrot.slane %v443_v6, 2  ;;  %v434_v40 = vsel %vm412_vm15, %v409_v2, 0.0 }
  0x2f   :  { %v435_v27 = vrot.slane %v434_v40, 4  ;;  %v460_v62 = vsub.s32 %v457_v48, %v1040_v50  ;;  %vm664_vm4 = vcmp.eq.s32.totalorder %v1040_v50, 1  ;;  %vm663_vm5 = vcmp.eq.s32.totalorder %v1040_v50, 0 }
  0x30   :  { %v417_v29 = vadd.f32 %v416_v23, %v415_v15  ;;  %v423_v30 = vrot.slane %v422_v25, 2  ;;  %v445_v39 = vadd.f32 %v444_v13, %v443_v6 }
  0x31   :  { %325 = vrot.lane.b32.xlu1 %v858_v53, %s770_s22  ;;  %v427_v53 = vsel %vm412_vm15, %v386_v44, 0.0  ;;  %v436_v46 = vadd.f32 %v435_v27, %v434_v40  ;;  %v405_v44 = vld [vmem:[#allocation3] sm:$0x1f] }
  0x32   :  { %307 = vrot.lane.b32.xlu0 %v951_v41, %s767_s18  ;;  %v424_v35 = vadd.f32 %v423_v30, %v422_v25  ;;  %v428_v36 = vrot.slane %v427_v53, 4  ;;  %v418_v42 = vrot.slane %v417_v29, 1  ;;  %v446_v4 = vrot.slane %v445_v39, 1 }
  0x33   :  { %v437_v58 = vrot.slane %v436_v46, 2 }
  0x34   :  { %v425_v19 = vrot.slane %v424_v35, 1  ;;  %v429_v5 = vadd.f32 %v428_v36, %v427_v53  ;;  %v419_v51 = vadd.f32 %v418_v42, %v417_v29  ;;  %v447_v6 = vadd.f32 %v446_v4, %v445_v39 }
  0x35   :  { %v438_v61 = vadd.f32 %v437_v58, %v436_v46 }
  0x36   :  { %323 = vrot.lane.b32.xlu0 %v951_v41, %s770_s22  ;;  %v430_v45 = vrot.slane %v429_v5, 2  ;;  %v426_v52 = vadd.f32 %v425_v19, %v424_v35  ;;  %v475_v7 = vrot.slane %v447_v6, %v460_v62 }
  0x37   :  { %v439_v16 = vrot.slane %v438_v61, 1 }
  0x38   :  { %v431_v56 = vadd.f32 %v430_v45, %v429_v5  ;;  %v453_v8 = vcombine.low %v419_v51, %v426_v52  ;;  %v490_v0 = vrot.slane %v475_v7, %v460_v62 }
  0x39   :  { %v440_v41 = vadd.f32 %v439_v16, %v438_v61  ;;  %v354_v61 = vmul.f32 %v862_v54, %v966_v47 }
  0x3a   :  { %v432_v59 = vrot.slane %v431_v56, 1  ;;  %v461_v18 = vrot.slane %v453_v8, %v460_v62 }
  0x3c   :  { %v433_v15 = vadd.f32 %v432_v59, %v431_v56 }
  0x3e   :  { %v454_v22 = vcombine.low %v433_v15, %v440_v41 }
  0x40   :  { %v468_v23 = vrot.slane %v454_v22, %v460_v62 }
  0x42   :  { %v476_v25 = vcombine.low %v461_v18, %v468_v23  ;;  %v350_v23 = vcombine.high %v966_v47, %v966_v47 }
  0x44   :  { %v483_v13 = vrot.slane %v476_v25, %v460_v62 }
  0x46   :  { %v491_v29 = vcombine.low %v483_v13, %v490_v0 }
  0x48   :  { %v493_v30 = vadd.f32 %v491_v29, %v405_v44 }
  0x4a   :  { %498 = vst.msk [vmem:[#allocation3] sm:$0x1f] %vm1006_vm12, %v493_v30 }
  0x86   :  { %v1045_v2 = vpop.permute.xlu1 %309 }
  0x8b   :  { %v739_v53 = vpop.permute.xlu1 %738  ;;  %v734_v35 = vpop.permute.xlu0 %733 }
  0x8c   :  { %v741_v38 = vunpack.i.h.bf16 %v739_v53  ;;  %v740_v39 = vunpack.i.l.bf16 %v739_v53  ;;  %v736_v40 = vunpack.i.h.bf16 %v734_v35  ;;  %v735_v42 = vunpack.i.l.bf16 %v734_v35 }
  0x8e   :  { %v300_v10 = vsel %vm295_vm13, %v741_v38, %v740_v39  ;;  %v284_v27 = vsel %vm279_vm14, %v736_v40, %v735_v42 }
  0x8f   :  { %v288_v36 = vpop.permute.xlu1 %287  ;;  %v333_v56 = vadd.f32 %v300_v10, %v284_v27 }
  0x90   :  { %v1047_v37 = vpop.permute.xlu0 %743  ;;  %v299_v0 = vsel %vm295_vm13, %v740_v39, %v288_v36 }
  0x91   :  { %v745_v45 = vunpack.i.l.bf16 %v1047_v37  ;;  %v746_v7 = vunpack.i.h.bf16 %v1047_v37 }
  0x93   :  { %v304_v19 = vpop.permute.xlu1 %303  ;;  %v316_v47 = vsel %vm311_vm1, %v1045_v2, %v745_v45 }
  0x94   :  { %v749_v5 = vpop.permute.xlu0 %748  ;;  %v315_v4 = vsel %vm311_vm1, %v745_v45, %v304_v19  ;;  %v314_v25 = vsel %vm311_vm1, %v304_v19, %v746_v7 }
  0x95   :  { %v750_v46 = vunpack.i.l.bf16 %v749_v5  ;;  %v751_v15 = vunpack.i.h.bf16 %v749_v5 }
  0x97   :  { %v320_v48 = vpop.permute.xlu1 %319 }
  0x98   :  { %v331_v51 = vsel %vm327_vm0, %v750_v46, %v320_v48  ;;  %v274_v52 = vpop.permute.xlu0 %273  ;;  %v330_v18 = vsel %vm327_vm0, %v320_v48, %v751_v15 }
  0x99   :  { %v338_v58 = vadd.f32 %v331_v51, %v315_v4  ;;  %v339_v44 = vadd.f32 %v330_v18, %v314_v25  ;;  %v351_v4 = vcombine.high %v1000_v17, %v1000_v17 }
  0x9b   :  { %v343_v59 = vadd.f32 %v338_v58, %v333_v56  ;;  %v276_v62 = vpop.permute.xlu1 %275 }
  0x9c   :  { %v290_v8 = vpop.permute.xlu0 %289  ;;  %v280_v53 = vsel %vm279_vm14, %v276_v62, %v736_v40  ;;  %v358_v40 = vmul.f32 %v851_v49, %v933_v33  ;;  %v281_v48 = vsel %vm279_vm14, %v274_v52, %v276_v62  ;;  %v390_v62 = vld [vmem:[#allocation2 + $0x10] sm:$0xf] }
  0x9d   :  { %v375_v6 = vmul.f32 %v930_v31, %v343_v59 }
  0x9f   :  { %v380_v16 = vadd.f32 %v375_v6, %v354_v61  ;;  %v292_v41 = vpop.permute.xlu1 %291 }
  0xa0   :  { %v272_v22 = vpop.permute.xlu0 %271  ;;  %v296_v31 = vsel %vm295_vm13, %v292_v41, %v741_v38  ;;  %v355_v38 = vmul.f32 %v867_v57, %v350_v23 }
  0xa1   :  { %v283_v13 = vsel %vm279_vm14, %v735_v42, %v272_v22  ;;  %v337_v37 = vadd.f32 %v296_v31, %v280_v53  ;;  %v297_v42 = vsel %vm295_vm13, %v290_v8, %v292_v41  ;;  %v282_v10 = vsel %vm279_vm14, %v272_v22, %v274_v52 }
  0xa2   :  { %v334_v29 = vadd.f32 %v299_v0, %v283_v13  ;;  %v336_v51 = vadd.f32 %v297_v42, %v281_v48  ;;  %v357_v22 = vmul.f32 %v894_v12, %v351_v4 }
  0xa3   :  { %v326_v30 = vpop.permute.xlu1 %325 }
  0xa4   :  { %v332_v35 = vsel %vm327_vm0, %v326_v30, %v750_v46  ;;  %v344_v39 = vadd.f32 %v339_v44, %v334_v29  ;;  %v308_v5 = vpop.permute.xlu0 %307  ;;  %v298_v46 = vsel %vm295_vm13, %v288_v36, %v290_v8 }
  0xa5   :  { %v342_v19 = vadd.f32 %v332_v35, %v316_v47  ;;  %v335_v56 = vadd.f32 %v298_v46, %v282_v10  ;;  %v312_v33 = vsel %vm311_vm1, %v308_v5, %v1045_v2  ;;  %v620_v35 = vsub.s32 0, %v1040_v50 }
  0xa6   :  { %v376_v27 = vmul.f32 %v958_v43, %v344_v39  ;;  %v313_v43 = vsel %vm311_vm1, %v746_v7, %v308_v5 }
  0xa7   :  { %v347_v45 = vadd.f32 %v342_v19, %v337_v37 }
  0xa8   :  { %v381_v58 = vadd.f32 %v376_v27, %v355_v38  ;;  %v324_v59 = vpop.permute.xlu0 %323  ;;  %v1118_v38 = vld [vmem:[#allocation3] sm:$0x1f] }
  0xa9   :  { %v379_v61 = vmul.f32 %v1031_v32, %v347_v45  ;;  %v328_v36 = vsel %vm327_vm0, %v324_v59, %v326_v30  ;;  %v329_v52 = vsel %vm327_vm0, %v751_v15, %v324_v59  ;;  %v356_v32 = vmul.f32 %v889_v11, %v1000_v17 }
  0xaa   :  { %v395_v6 = vcombine.low %v380_v16, %v381_v58  ;;  %v340_v8 = vadd.f32 %v329_v52, %v313_v43  ;;  %v341_v41 = vadd.f32 %v328_v36, %v312_v33  ;;  %v764_v3 = vcombine.low %v381_v58, %v381_v58 }
  0xab   :  { %v384_v18 = vadd.f32 %v379_v61, %v358_v40  ;;  %v621_v48 = vrot.slane %v1118_v38, %v620_v35  ;;  %v632_v43 = vsub.s32 3, %v1040_v50  ;;  %v636_v36 = vsub.s32 4, %v1040_v50 }
  0xac   :  { %v345_v2 = vadd.f32 %v340_v8, %v335_v56  ;;  %v346_v23 = vadd.f32 %v341_v41, %v336_v51  ;;  %v511_v15 = vsel %vm412_vm15, %v395_v6, 0.0  ;;  %v518_v44 = vsel %vm412_vm15, %v764_v3, 0.0 }
  0xad   :  { %v401_v0 = vadd.f32 %v390_v62, %v384_v18  ;;  %v512_v16 = vrot.slane %v511_v15, 4  ;;  %v519_v17 = vrot.slane %v518_v44, 4  ;;  %v628_v51 = vsub.s32 2, %v1040_v50 }
  0xae   :  { %v377_v7 = vmul.f32 %v1023_v26, %v345_v2  ;;  %v378_v25 = vmul.f32 %v1026_v28, %v346_v23  ;;  %v624_v26 = vsub.s32 1, %v1040_v50  ;;  %v633_v35 = vrot.slane %v1118_v38, %v632_v43 }
  0xaf   :  { %404 = vst [vmem:[#allocation2 + $0x10] sm:$0xf] %v401_v0  ;;  %v513_v29 = vadd.f32 %v512_v16, %v511_v15  ;;  %v520_v47 = vadd.f32 %v519_v17, %v518_v44 }
  0xb0   :  { %v382_v31 = vadd.f32 %v377_v7, %v356_v32  ;;  %v383_v13 = vadd.f32 %v378_v25, %v357_v22  ;;  %v625_v4 = vrot.slane %v1118_v38, %v624_v26  ;;  %v629_v32 = vrot.slane %v1118_v38, %v628_v51 }
  0xb1   :  { %v514_v53 = vrot.slane %v513_v29, 2  ;;  %v521_v39 = vrot.slane %v520_v47, 2  ;;  %v643_v22 = vsel %vm551_vm2, %v621_v48, 0.0 }
  0xb2   :  { %v396_v30 = vcombine.low %v382_v31, %v383_v13  ;;  %v765_v19 = vcombine.low %v383_v13, %v383_v13  ;;  %v644_v7 = vsel %vm551_vm2, %v625_v4, 0.0  ;;  %v646_v26 = vsel %vm551_vm2, %v629_v32, 0.0 }
  0xb3   :  { %v515_v28 = vadd.f32 %v514_v53, %v513_v29  ;;  %v522_v40 = vadd.f32 %v521_v39, %v520_v47 }
  0xb4   :  { %v525_v5 = vsel %vm412_vm15, %v396_v30, 0.0  ;;  %v532_v46 = vsel %vm412_vm15, %v765_v19, 0.0 }
  0xb5   :  { %v516_v10 = vrot.slane %v515_v28, 1  ;;  %v526_v27 = vrot.slane %v525_v5, 4  ;;  %v523_v58 = vrot.slane %v522_v40, 1  ;;  %v533_v61 = vrot.slane %v532_v46, 4 }
  0xb6   :  { %v504_v37 = vld [vmem:[#allocation2 + $0x10] sm:$0xf] }
  0xb7   :  { %v539_v42 = vsel %vm412_vm15, %v504_v37, 0.0  ;;  %v517_v56 = vadd.f32 %v516_v10, %v515_v28  ;;  %v527_v59 = vadd.f32 %v526_v27, %v525_v5  ;;  %v524_v52 = vadd.f32 %v523_v58, %v522_v40 }
  0xb8   :  { %v540_v45 = vrot.slane %v539_v42, 4  ;;  %v534_v6 = vadd.f32 %v533_v61, %v532_v46  ;;  %v645_v40 = vadd.f32 %v644_v7, %v643_v22  ;;  %vm667_vm15 = vcmp.eq.s32.totalorder %v1040_v50, 3 }
  0xb9   :  { %v528_v62 = vrot.slane %v527_v59, 2  ;;  %v570_v8 = vmul.f32 %v911_v20, %v517_v56  ;;  %v593_v18 = vmul.f32 %v918_v24, %v517_v56  ;;  %v571_v0 = vmul.f32 %v936_v1, %v524_v52 }
  0xba   :  { %v541_v33 = vadd.f32 %v540_v45, %v539_v42  ;;  %v535_v23 = vrot.slane %v534_v6, 2  ;;  %v546_v3 = vmul.f32 %v862_v54, %v517_v56  ;;  %v547_v15 = vmul.f32 %v867_v57, %v524_v52 }
  0xbb   :  { %v529_v2 = vadd.f32 %v528_v62, %v527_v59  ;;  %v594_v20 = vmul.f32 %v939_v34, %v524_v52  ;;  %v575_v24 = vsel %vm551_vm2, %v570_v8, 0.0  ;;  %v576_v13 = vsel %vm551_vm2, %v571_v0, 0.0 }
  0xbc   :  { %v542_v41 = vrot.slane %v541_v33, 2  ;;  %v536_v31 = vadd.f32 %v535_v23, %v534_v6  ;;  %v577_v29 = vadd.f32 %v576_v13, %v575_v24  ;;  %v598_v17 = vsel %vm551_vm2, %v593_v18, 0.0 }
  0xbd   :  { %v530_v16 = vrot.slane %v529_v2, 1  ;;  %v599_v1 = vsel %vm551_vm2, %v594_v20, 0.0  ;;  %v553_v54 = vsel %vm551_vm2, %v547_v15, 0.0  ;;  %v552_v34 = vsel %vm551_vm2, %v546_v3, 0.0 }
  0xbe   :  { %v543_v25 = vadd.f32 %v542_v41, %v541_v33  ;;  %v537_v53 = vrot.slane %v536_v31, 1  ;;  %v600_v47 = vadd.f32 %v599_v1, %v598_v17  ;;  %v554_v10 = vadd.f32 %v553_v54, %v552_v34 }
  0xbf   :  { %v531_v30 = vadd.f32 %v530_v16, %v529_v2 }
  0xc0   :  { %v544_v44 = vrot.slane %v543_v25, 1  ;;  %v538_v37 = vadd.f32 %v537_v53, %v536_v31 }
  0xc1   :  { %v572_v28 = vmul.f32 %v984_v60, %v531_v30  ;;  %v548_v39 = vmul.f32 %v889_v11, %v531_v30  ;;  %v595_v19 = vmul.f32 %v995_v9, %v531_v30  ;;  %v637_v9 = vrot.slane %v1118_v38, %v636_v36 }
  0xc2   :  { %v545_v57 = vadd.f32 %v544_v44, %v543_v25  ;;  %v573_v27 = vmul.f32 %v987_v63, %v538_v37  ;;  %v549_v46 = vmul.f32 %v894_v12, %v538_v37  ;;  %v596_v51 = vmul.f32 %v998_v14, %v538_v37 }
  0xc3   :  { %v578_v45 = vsel %vm551_vm2, %v572_v28, 0.0  ;;  %v555_v48 = vsel %vm551_vm2, %v548_v39, 0.0  ;;  %v601_v63 = vsel %vm551_vm2, %v595_v19, 0.0  ;;  %v647_v12 = vadd.f32 %v646_v26, %v645_v40 }
  0xc4   :  { %v574_v5 = vmul.f32 %v977_v55, %v545_v57  ;;  %v550_v42 = vmul.f32 %v851_v49, %v545_v57  ;;  %v579_v4 = vadd.f32 %v578_v45, %v577_v29  ;;  %v556_v60 = vadd.f32 %v555_v48, %v554_v10 }
  0xc5   :  { %v597_v11 = vmul.f32 %v1014_v21, %v545_v57  ;;  %v580_v55 = vsel %vm551_vm2, %v573_v27, 0.0  ;;  %v557_v49 = vsel %vm551_vm2, %v549_v46, 0.0  ;;  %v602_v59 = vadd.f32 %v601_v63, %v600_v47 }
  0xc6   :  { %v581_v56 = vadd.f32 %v580_v55, %v579_v4  ;;  %v558_v58 = vadd.f32 %v557_v49, %v556_v60  ;;  %v582_v61 = vsel %vm551_vm2, %v574_v5, 0.0  ;;  %v559_v33 = vsel %vm551_vm2, %v550_v42, 0.0 }
  0xc7   :  { %v603_v21 = vsel %vm551_vm2, %v596_v51, 0.0  ;;  %v648_v38 = vsel %vm551_vm2, %v633_v35, 0.0  ;;  %v605_v62 = vsel %vm551_vm2, %v597_v11, 0.0  ;;  %v650_v8 = vsel %vm551_vm2, %v637_v9, 0.0 }
  0xc8   :  { %v583_v43 = vadd.f32 %v582_v61, %v581_v56  ;;  %v560_v36 = vadd.f32 %v559_v33, %v558_v58  ;;  %v604_v52 = vadd.f32 %v603_v21, %v602_v59  ;;  %v649_v6 = vadd.f32 %v648_v38, %v647_v12 }
  0xca   :  { %584 = vadd.xlane.f32.xlu1 %v583_v43  ;;  %561 = vadd.xlane.f32.xlu0 %v560_v36  ;;  %v606_v14 = vadd.f32 %v605_v62, %v604_v52  ;;  %v651_v41 = vadd.f32 %v650_v8, %v649_v6 }
  0xce   :  { %607 = vadd.xlane.f32.xlu0 %v606_v14 }
  0xd2   :  { %652 = vadd.xlane.f32.xlu0 %v651_v41 }
 0x157   :  { %v585_v18 = vpop.xlane.xlu1 %584  ;;  %v562_v32 = vpop.xlane.xlu0 %561 }
 0x158   :  { %v586_v22 = vrot.slane %v585_v18, 4  ;;  %v563_v2 = vrot.slane %v562_v32, 4 }
 0x15a   :  { %v587_v23 = vadd.f32 %v586_v22, %v585_v18  ;;  %v564_v0 = vadd.f32 %v563_v2, %v562_v32 }
 0x15b   :  { %v608_v7 = vpop.xlane.xlu0 %607 }
 0x15c   :  { %v588_v25 = vrot.slane %v587_v23, 2  ;;  %v565_v3 = vrot.slane %v564_v0, 2  ;;  %v609_v15 = vrot.slane %v608_v7, 4 }
 0x15e   :  { %v589_v20 = vadd.f32 %v588_v25, %v587_v23  ;;  %v610_v16 = vadd.f32 %v609_v15, %v608_v7  ;;  %v566_v31 = vadd.f32 %v565_v3, %v564_v0 }
 0x15f   :  { %v653_v24 = vpop.xlane.xlu0 %652 }
 0x160   :  { %v611_v13 = vrot.slane %v610_v16, 2  ;;  %v654_v44 = vrot.slane %v653_v24, 4  ;;  %v567_v29 = vrot.slane %v566_v31, 1  ;;  %v590_v17 = vrot.slane %v589_v20, 1 }
 0x162   :  { %v655_v1 = vadd.f32 %v654_v44, %v653_v24  ;;  %v568_v30 = vadd.f32 %v567_v29, %v566_v31  ;;  %v591_v53 = vadd.f32 %v590_v17, %v589_v20  ;;  %v612_v54 = vadd.f32 %v611_v13, %v610_v16 }
 0x164   :  { %v656_v47 = vrot.slane %v655_v1, 2  ;;  %718 = vpush %v568_v30  ;;  %v613_v57 = vrot.slane %v612_v54, 1 }
 0x165   :  { %720 = vpush %v591_v53 }
 0x166   :  { %v657_v34 = vadd.f32 %v656_v47, %v655_v1  ;;  %v614_v35 = vadd.f32 %v613_v57, %v612_v54 }
 0x168   :  { %722 = vpush %v614_v35  ;;  %v658_v26 = vrot.slane %v657_v34, 1 }
 0x16a   :  { %v659_v37 = vadd.f32 %v658_v26, %v657_v34 }
 0x16c   :  { %724 = vpush %v659_v37 }
 0x195   :  { %s719_s23 = spop %718 }
 0x196   :  { %s721_s24 = spop %720 }
 0x197   :  { %v670_v19 = vstv %s721_s24 }
 0x199   :  { %s723_s25 = spop %722 }
 0x19a   :  { %v668_v28 = vstv %s723_s25 }
 0x19b   :  { %v669_v39 = vsel %vm667_vm15, %v668_v28, 0.0 }
 0x19c   :  { %v671_v5 = vsel %vm666_vm3, %v670_v19, %v669_v39 }
 0x19d   :  { %s725_s26 = spop %724 }
 0x19e   :  { %s665_s27 = ssub.f32 %s719_s23, %s725_s26  ;;  %v674_v40 = vstv %s725_s26 }
 0x1a0   :  { %v672_v42 = vstv %s665_s27 }
 0x1a1   :  { %v673_v10 = vsel %vm664_vm4, %v672_v42, %v671_v5 }
 0x1a2   :  { %v675_v27 = vsel %vm663_vm5, %v674_v40, %v673_v10 }
 0x1a3   :  { %676 = vst [vmem:[%s1175_s2] sm:$0xff] %v675_v27 }

</bundles_post_ra>
